<compile_context>
chip_gen: v6e
topology: v6e:2x2x1
jax: 0.10.0
libtpu: 0.0.40
codegen_flags: <defaults>
</compile_context>

<pallas_src>
import jax
import jax.numpy as jnp
from jax.experimental import pallas as pl
from jax.experimental.pallas import tpu as pltpu

_LANE = 128    # lane width (last dim of a vreg / MXU tile)
_SUBLANE = 8   # f32 sublane count (second-to-last dim)


def _round_up(x, m):
    return ((x + m - 1) // m) * m


def _default_vmem_budget():
    """Generation-aware VMEM budget (bytes) used both for the fused-path fit
    test and as the scoped vmem_limit_bytes passed to the compiler."""
    try:
        cap = int(pltpu.get_tpu_info().vmem_capacity_bytes)
    except Exception:
        cap = 64 * 1024 * 1024  # conservative (v7x per-core VMEM)
    # ~45% of capacity leaves headroom for Mosaic internal scratch and any
    # pipeline buffers we did not account for; never ask for more than 48 MiB.
    return max(24 << 20, min(int(cap * 0.45), 48 << 20))


def _pick_tile(size, align, cap):
    """Largest multiple of `align` that divides `size` and is <= cap.
    `size` must already be a multiple of `align`."""
    t = min(size, cap)
    t -= t % align
    while t > align and size % t:
        t -= align
    return t


def _pad_and_tile(size, align, cap):
    """Pad `size` to a multiple of `align`, then pick a tile that divides the
    padded size.  If the divisor structure is awkward (< 128), pad further to a
    multiple of a 256 tile instead of running tiny MXU panels."""
    padded = _round_up(max(size, 1), align)
    if padded <= cap:
        return padded, padded
    tile = _pick_tile(padded, align, cap)
    if tile < 128:
        tile = min(cap, 256)
        padded = _round_up(size, tile)
    return padded, tile


# -----------------------------------------------------------------------------
# Fused path: W VMEM-resident, one pallas_call, per-panel projection cached in
# a VMEM scratch, big operand streamed.
# -----------------------------------------------------------------------------
_NT = (((1,), (1,)), ((), ()))  # contract both operands' last axes


def _make_fused_kernel(compute_dtype, pos_first):
    if pos_first:
        # grid = (i over positive panels [parallel], j over anchor tiles [arbitrary])
        def kernel(pos_ref, anc_ref, w_ref, out_ref, tmp_ref):
            @pl.when(pl.program_id(1) == 0)
            def _():
                # tmp = pos_panel @ W   (tm, D), f32 accumulate, once per panel
                tmp_ref[...] = jnp.dot(
                    pos_ref[...].astype(compute_dtype),
                    w_ref[...].astype(compute_dtype),
                    preferred_element_type=jnp.float32)

            # out = tmp @ anchor_tile^T  (contract last axes, no transpose)
            out_ref[...] = jax.lax.dot_general(
                tmp_ref[...].astype(compute_dtype),
                anc_ref[...].astype(compute_dtype),
                dimension_numbers=_NT,
                preferred_element_type=jnp.float32).astype(out_ref.dtype)
    else:
        # grid = (j over anchor panels [parallel], i over positive tiles [arbitrary])
        def kernel(pos_ref, anc_ref, w_ref, out_ref, tmp_ref):
            @pl.when(pl.program_id(1) == 0)
            def _():
                # tmp = anchor_panel @ W^T   (tn, D), once per anchor panel
                tmp_ref[...] = jax.lax.dot_general(
                    anc_ref[...].astype(compute_dtype),
                    w_ref[...].astype(compute_dtype),
                    dimension_numbers=_NT,
                    preferred_element_type=jnp.float32)

            # out = pos_tile @ tmp^T
            out_ref[...] = jax.lax.dot_general(
                pos_ref[...].astype(compute_dtype),
                tmp_ref[...].astype(compute_dtype),
                dimension_numbers=_NT,
                preferred_element_type=jnp.float32).astype(out_ref.dtype)
    return kernel


def _fused_tiled(pos_p, anc_p, w_p, out_dtype, compute_dtype, tm, tn,
                 pos_first, vmem_limit_bytes):
    np_p, d_p = pos_p.shape
    na_p, _ = anc_p.shape
    kernel = _make_fused_kernel(compute_dtype, pos_first)
    if pos_first:
        grid = (np_p // tm, na_p // tn)
        pos_map = lambda i, j: (i, 0)
        anc_map = lambda i, j: (j, 0)
        out_map = lambda i, j: (i, j)
        tmp_shape = (tm, d_p)
    else:
        grid = (na_p // tn, np_p // tm)
        pos_map = lambda j, i: (i, 0)
        anc_map = lambda j, i: (j, 0)
        out_map = lambda j, i: (i, j)
        tmp_shape = (tn, d_p)

    return pl.pallas_call(
        kernel,
        out_shape=jax.ShapeDtypeStruct((np_p, na_p), out_dtype),
        grid_spec=pltpu.PrefetchScalarGridSpec(
            num_scalar_prefetch=0,
            grid=grid,
            in_specs=[
                pl.BlockSpec((tm, d_p), pos_map),
                pl.BlockSpec((tn, d_p), anc_map),
                pl.BlockSpec((d_p, d_p), lambda a, b: (0, 0)),  # W resident
            ],
            out_specs=pl.BlockSpec((tm, tn), out_map),
            scratch_shapes=[pltpu.VMEM(tmp_shape, jnp.float32)],
        ),
        compiler_params=pltpu.CompilerParams(
            dimension_semantics=("parallel", "arbitrary"),
            vmem_limit_bytes=int(vmem_limit_bytes)),
    )(pos_p, anc_p, w_p)


def _plan_fused(n_pos, n_anchor, dim, in_itemsize, out_itemsize, budget, pos_first):
    """Return (d_p, np_p, na_p, tm, tn) if the fused kernel fits the VMEM
    budget, else None."""
    d_p = _round_up(dim, _LANE)
    w_bytes = 2 * d_p * d_p * in_itemsize  # conservatively assume double-buffer
    for cap in (512, 256, 128):
        np_p, tm = _pad_and_tile(n_pos, _SUBLANE, cap)
        na_p, tn = _pad_and_tile(n_anchor, _LANE, cap)
        tmp_rows = tm if pos_first else tn
        need = (w_bytes
                + 2 * tm * d_p * in_itemsize    # positive blocks
                + 2 * tn * d_p * in_itemsize    # anchor blocks
                + 2 * tm * tn * out_itemsize    # output blocks
                + tmp_rows * d_p * 4)           # f32 projection scratch
        if need <= budget:
            return d_p, np_p, na_p, tm, tn
    return None


# -----------------------------------------------------------------------------
# Fallback for huge dim (W not VMEM-resident): k-tiled matmuls with an HBM
# intermediate.  NT variant contracts both operands' last axes (B given as
# (N, K)); the k-grid / accumulator is dropped when K fits one block.
# -----------------------------------------------------------------------------
def _matmul_tiled(a, b, out_dtype, compute_dtype, *, nt, vmem_limit_bytes,
                  tile_cap=512):
    m, k = a.shape
    n = b.shape[0] if nt else b.shape[1]
    assert (b.shape[1] if nt else b.shape[0]) == k
    tm = _pick_tile(m, _SUBLANE, tile_cap)
    tn = _pick_tile(n, _LANE, tile_cap)
    tk = _pick_tile(k, _LANE, tile_cap)
    nk = k // tk
    dims = _NT if nt else (((1,), (0,)), ((), ()))

    if nk == 1:
        # K fits in a single block: no k-grid, no accumulator read-modify-write.
        def kernel(a_ref, b_ref, o_ref):
            o_ref[...] = jax.lax.dot_general(
                a_ref[...].astype(compute_dtype),
                b_ref[...].astype(compute_dtype),
                dimension_numbers=dims,
                preferred_element_type=jnp.float32).astype(o_ref.dtype)

        grid = (m // tm, n // tn)
        a_spec = pl.BlockSpec((tm, tk), lambda i, j: (i, 0))
        b_spec = (pl.BlockSpec((tn, tk), lambda i, j: (j, 0)) if nt
                  else pl.BlockSpec((tk, tn), lambda i, j: (0, j)))
        out_spec = pl.BlockSpec((tm, tn), lambda i, j: (i, j))
        scratch = ()
        semantics = ("parallel", "parallel")
    else:
        def kernel(a_ref, b_ref, o_ref, acc_ref):
            @pl.when(pl.program_id(2) == 0)
            def _():
                acc_ref[...] = jnp.zeros_like(acc_ref)

            acc_ref[...] += jax.lax.dot_general(
                a_ref[...].astype(compute_dtype),
                b_ref[...].astype(compute_dtype),
                dimension_numbers=dims,
                preferred_element_type=jnp.float32)

            @pl.when(pl.program_id(2) == pl.num_programs(2) - 1)
            def _():
                o_ref[...] = acc_ref[...].astype(o_ref.dtype)

        grid = (m // tm, n // tn, nk)
        a_spec = pl.BlockSpec((tm, tk), lambda i, j, kk: (i, kk))
        b_spec = (pl.BlockSpec((tn, tk), lambda i, j, kk: (j, kk)) if nt
                  else pl.BlockSpec((tk, tn), lambda i, j, kk: (kk, j)))
        out_spec = pl.BlockSpec((tm, tn), lambda i, j, kk: (i, j))
        scratch = (pltpu.VMEM((tm, tn), jnp.float32),)
        semantics = ("parallel", "parallel", "arbitrary")

    return pl.pallas_call(
        kernel,
        out_shape=jax.ShapeDtypeStruct((m, n), out_dtype),
        grid_spec=pltpu.PrefetchScalarGridSpec(
            num_scalar_prefetch=0,
            grid=grid,
            in_specs=[a_spec, b_spec],
            out_specs=out_spec,
            scratch_shapes=scratch,
        ),
        compiler_params=pltpu.CompilerParams(
            dimension_semantics=semantics,
            vmem_limit_bytes=int(vmem_limit_bytes)),
    )(a, b)


# -----------------------------------------------------------------------------
# Public wrapper: out = positive @ W @ anchor.T
# -----------------------------------------------------------------------------
def bilinear_product(positive, anchor, w, *, mxu_dtype=None,
                     vmem_budget_bytes=None):
    n_pos, dim = positive.shape
    n_anchor, dim2 = anchor.shape
    assert dim == dim2 and w.shape == (dim, dim)
    out_dtype = positive.dtype
    # MXU input dtype (cast happens inside the kernels); accumulation is f32.
    compute_dtype = (jnp.dtype(mxu_dtype) if mxu_dtype is not None
                     else jnp.dtype(positive.dtype))

    hw_vmem = _default_vmem_budget()
    budget = int(vmem_budget_bytes) if vmem_budget_bytes is not None else hw_vmem

    # Contract W against the smaller operand (static FLOP-based choice).
    pos_first = n_pos <= n_anchor

    in_es = max(jnp.dtype(positive.dtype).itemsize,
                jnp.dtype(anchor.dtype).itemsize,
                jnp.dtype(w.dtype).itemsize)
    out_es = jnp.dtype(out_dtype).itemsize

    plan = _plan_fused(n_pos, n_anchor, dim, in_es, out_es, budget, pos_first)
    if plan is not None:
        d_p, np_p, na_p, tm, tn = plan
        pos_p = jnp.pad(positive, ((0, np_p - n_pos), (0, d_p - dim)))
        anc_p = jnp.pad(anchor, ((0, na_p - n_anchor), (0, d_p - dim)))
        w_p = jnp.pad(w, ((0, d_p - dim), (0, d_p - dim)))
        out_p = _fused_tiled(pos_p, anc_p, w_p, out_dtype, compute_dtype,
                             tm, tn, pos_first, vmem_limit_bytes=hw_vmem)
        return out_p[:n_pos, :n_anchor]

    # ----- fallback: dim too large for a VMEM-resident W ----------------------
    np_p = _round_up(n_pos, _SUBLANE)
    na_p = _round_up(n_anchor, _LANE)
    d_p = _round_up(dim, _LANE)
    pos_p = jnp.pad(positive, ((0, np_p - n_pos), (0, d_p - dim)))
    anc_p = jnp.pad(anchor, ((0, na_p - n_anchor), (0, d_p - dim)))
    w_p = jnp.pad(w, ((0, d_p - dim), (0, d_p - dim)))

    if pos_first:
        # tmp = positive @ W          (np_p, d_p), f32 intermediate in HBM
        tmp = _matmul_tiled(pos_p, w_p, jnp.float32, compute_dtype,
                            nt=False, vmem_limit_bytes=hw_vmem)
        # out = tmp @ anchor^T        (np_p, na_p)
        out_p = _matmul_tiled(tmp, anc_p, out_dtype, compute_dtype,
                              nt=True, vmem_limit_bytes=hw_vmem)
    else:
        # proj = anchor @ W^T         (na_p, d_p)
        proj = _matmul_tiled(anc_p, w_p, jnp.float32, compute_dtype,
                             nt=True, vmem_limit_bytes=hw_vmem)
        # out = positive @ proj^T     (np_p, na_p) == positive @ W @ anchor^T
        out_p = _matmul_tiled(pos_p, proj, out_dtype, compute_dtype,
                              nt=True, vmem_limit_bytes=hw_vmem)
    return out_p[:n_pos, :n_anchor]


def _ref_bilinear(positive, anchor, w):
    hp = jax.lax.Precision.HIGHEST
    proj = jax.lax.dot(w, anchor.T, precision=hp)
    return jax.lax.dot(positive, proj, precision=hp)


if __name__ == "__main__":
    key = jax.random.PRNGKey(0)
    keys = jax.random.split(key, 12)
    epsilon = 0.13

    def make(kw, kp, ka, dim, n_pos, n_anchor):
        w = jax.random.normal(kw, (dim, dim), dtype=jnp.float32) * epsilon
        pos = jax.random.normal(kp, (n_pos, dim), dtype=jnp.float32)
        anc = jax.random.normal(ka, (n_anchor, dim), dtype=jnp.float32)
        return pos, anc, w

    # 1) Tiny shapes matching the module's typical use (fused, grid (1,1)).
    pos, anc, w = make(keys[0], keys[1], keys[2], 32, 8, 8)
    out = jax.block_until_ready(bilinear_product(pos, anc, w))
    ref = _ref_bilinear(pos, anc, w)
    assert out.shape == (8, 8)
    assert jnp.allclose(out, ref, atol=1e-3, rtol=1e-3)

    # 2) pos-first with a real inner grid (anchor streamed in 5 tiles).
    pos, anc, w = make(keys[3], keys[4], keys[5], 128, 48, 640)
    out = jax.block_until_ready(bilinear_product(pos, anc, w))
    assert out.shape == (48, 640)
    assert jnp.allclose(out, _ref_bilinear(pos, anc, w), atol=5e-2, rtol=5e-3)

    # 3) anchor-first branch (n_pos > n_anchor), positive streamed.
    pos, anc, w = make(keys[6], keys[7], keys[8], 128, 640, 48)
    out = jax.block_until_ready(bilinear_product(pos, anc, w))
    assert out.shape == (640, 48)
    assert jnp.allclose(out, _ref_bilinear(pos, anc, w), atol=5e-2, rtol=5e-3)

    # 4) bf16 MXU inputs with f32 accumulation (opt-in), loose tolerance.
    pos, anc, w = make(keys[9], keys[10], keys[11], 64, 16, 256)
    out = jax.block_until_ready(
        bilinear_product(pos, anc, w, mxu_dtype=jnp.bfloat16))
    assert out.shape == (16, 256)
    assert jnp.allclose(out, _ref_bilinear(pos, anc, w), atol=0.3, rtol=0.05)

    # 5) Forced fallback path (HBM intermediate, K in a single block -> no acc).
    pos, anc, w = make(keys[0], keys[4], keys[8], 256, 64, 384)
    out = jax.block_until_ready(
        bilinear_product(pos, anc, w, vmem_budget_bytes=1))
    assert out.shape == (64, 384)
    assert jnp.allclose(out, _ref_bilinear(pos, anc, w), atol=5e-2, rtol=5e-3)

    # 6) Forced fallback with a k-grid reduction (d_p = 640 > 512 tile).
    pos, anc, w = make(keys[1], keys[5], keys[9], 640, 32, 256)
    out = jax.block_until_ready(
        bilinear_product(pos, anc, w, vmem_budget_bytes=1))
    assert out.shape == (32, 256)
    assert jnp.allclose(out, _ref_bilinear(pos, anc, w), atol=5e-2, rtol=5e-3)

    print("KERNEL_OK")
</pallas_src>

<mosaic_0001>
module attributes {stable_mosaic.version = 11 : i64} {
  func.func @kernel(%arg0: i32, %arg1: i32, %arg2: memref<8x128xf32, #tpu.memory_space<vmem>>, %arg3: memref<128x128xf32, #tpu.memory_space<vmem>>, %arg4: memref<128x128xf32, #tpu.memory_space<vmem>>, %arg5: memref<8x128xf32, #tpu.memory_space<vmem>>, %arg6: memref<8x128xf32, #tpu.memory_space<vmem>>) attributes {dimension_semantics = [#tpu.dimension_semantics<parallel>, #tpu.dimension_semantics<arbitrary>], iteration_bounds = array<i64: 1, 1>, scalar_prefetch = 0 : i64, scratch_operands = 1 : i64, tpu.core_type = #tpu.core_type<tc>, window_params = [{transform_indices = @transform_0, window_bounds = array<i64: 8, 128>}, {transform_indices = @transform_1, window_bounds = array<i64: 128, 128>}, {pipeline_mode = #tpu.pipeline_mode<synchronous>, transform_indices = @transform_2, window_bounds = array<i64: 128, 128>}, {transform_indices = @transform_3, window_bounds = array<i64: 8, 128>}]} {
    %c0_i32 = arith.constant 0 : i32
    %0 = arith.cmpi eq, %arg1, %c0_i32 : i32
    %1 = arith.extui %0 : i1 to i32
    %c0_i32_0 = arith.constant 0 : i32
    %2 = arith.cmpi ne, %1, %c0_i32_0 : i32
    scf.if %2 {
      %c0_6 = arith.constant 0 : index
      %c0_7 = arith.constant 0 : index
      %7 = vector.load %arg2[%c0_6, %c0_7] : memref<8x128xf32, #tpu.memory_space<vmem>>, vector<8x128xf32>
      %c0_8 = arith.constant 0 : index
      %c0_9 = arith.constant 0 : index
      %8 = vector.load %arg4[%c0_8, %c0_9] : memref<128x128xf32, #tpu.memory_space<vmem>>, vector<128x128xf32>
      %cst_10 = arith.constant dense<0.000000e+00> : vector<8x128xf32>
      %9 = tpu.matmul %7, %8, %cst_10 {dimension_numbers = #tpu.dot_dimension_numbers<[1], [0], [0], [1], [0, 0, 1, 1], [], []>} : vector<8x128xf32>, vector<128x128xf32>, vector<8x128xf32> -> vector<8x128xf32>
      %c0_11 = arith.constant 0 : index
      %c0_12 = arith.constant 0 : index
      %10 = vector.load %arg6[%c0_11, %c0_12] : memref<8x128xf32, #tpu.memory_space<vmem>>, vector<8x128xf32>
      tpu.vector_store %arg6[%c0_11, %c0_12], %9 {strides = array<i32>} : memref<8x128xf32, #tpu.memory_space<vmem>>, vector<8x128xf32>,
    } else {
    }
    %c0 = arith.constant 0 : index
    %c0_1 = arith.constant 0 : index
    %3 = vector.load %arg6[%c0, %c0_1] : memref<8x128xf32, #tpu.memory_space<vmem>>, vector<8x128xf32>
    %c0_2 = arith.constant 0 : index
    %c0_3 = arith.constant 0 : index
    %4 = vector.load %arg3[%c0_2, %c0_3] : memref<128x128xf32, #tpu.memory_space<vmem>>, vector<128x128xf32>
    %cst = arith.constant dense<0.000000e+00> : vector<8x128xf32>
    %5 = tpu.matmul %3, %4, %cst {dimension_numbers = #tpu.dot_dimension_numbers<[1], [1], [0], [0], [0, 0, 1, 0], [], []>} : vector<8x128xf32>, vector<128x128xf32>, vector<8x128xf32> -> vector<8x128xf32>
    %c0_4 = arith.constant 0 : index
    %c0_5 = arith.constant 0 : index
    %6 = vector.load %arg5[%c0_4, %c0_5] : memref<8x128xf32, #tpu.memory_space<vmem>>, vector<8x128xf32>
    tpu.vector_store %arg5[%c0_4, %c0_5], %5 {strides = array<i32>} : memref<8x128xf32, #tpu.memory_space<vmem>>, vector<8x128xf32>,
    return
  }
  func.func @transform_0(%arg0: i32, %arg1: i32) -> (i32, i32) {
    %c0_i32 = arith.constant 0 : i32
    %c0_i32_0 = arith.constant 0 : i32
    return %arg0, %c0_i32 : i32, i32
  }
  func.func @transform_1(%arg0: i32, %arg1: i32) -> (i32, i32) {
    %c0_i32 = arith.constant 0 : i32
    %c0_i32_0 = arith.constant 0 : i32
    return %arg1, %c0_i32 : i32, i32
  }
  func.func @transform_2(%arg0: i32, %arg1: i32) -> (i32, i32) {
    %c0_i32 = arith.constant 0 : i32
    %c0_i32_0 = arith.constant 0 : i32
    %c0_i32_1 = arith.constant 0 : i32
    return %c0_i32, %c0_i32_0 : i32, i32
  }
  func.func @transform_3(%arg0: i32, %arg1: i32) -> (i32, i32) {
    %c0_i32 = arith.constant 0 : i32
    return %arg0, %arg1 : i32, i32
  }
}

</mosaic_0001>

<bundles_post_ra>
// kernel: tpu_custom_call.1
= control target key start
LH: loop header
LB: loop body
LE: loop exit
PB: predicated region body
PF: predicated region fallthrough
CT: control target
= control target key end

     0   :  { %8 = vsyncpa [#allocation4], 0  ;;  %s522_s0 = inlined_call_operand.hbm [shape: f32[8,128], index: 0, kind: input, shape index: {}]   ;;  %s523_s1 = inlined_call_operand.hbm [shape: f32[128,128], index: 1, kind: input, shape index: {}]   ;;  %s524_s2 = inlined_call_operand.hbm [shape: f32[128,128], index: 2, kind: input, shape index: {}]   ;;  %s525_s3 = inlined_call_operand.hbm [shape: f32[8,128], index: 3, kind: output, shape index: {}]  }
   0x1   :  { %9 = vsyncpa [#allocation7], 0 }
   0x2   :  { %10 = vsyncpa [#allocation5], 0  ;;  %s448_s12 = smov [#allocation6]  }
   0x3   :  { %s26_s13 = sshll.u32 %s448_s12, 4  ;;  %s27_s13 = int_to_ptr.vmem [resolvable:$true] %s26_s13 }
   0x4   :  { %s370_s14 = scalar_lea.vmem %s27_s13, 2048  ;;  %p375_p1 = scmp.lt.s32.totalorder %s27_s13, %s27_s13 }
   0x5   :  { %p371_p0 = scmp.ne.s32.totalorder %s27_s13, %s370_s14  ;;  %p376_p2 = scmp.lt.s32.totalorder %s370_s14, %s370_s14 }
   0x7   :  { %p377_p3 = por %p376_p2, %p375_p1 }
   0x9   :  { %p378_p4 = pnand %p377_p3, %p371_p0 }
   0xb   :  { %381 = shalt.err (!%p378_p4)
}
   0xc   :  { %s449_s15 = smov 128   ;;  %s450_s16 = smov 8  }
   0xd   :  { %32 = dma.hbm_to_vmem [thread:$0]  %s523_s1, 2048, %s27_s13, [#allocation7], %s449_s15, %s449_s15, %s450_s16  }
   0xe   :  { %s451_s19 = smov [#allocation3]   ;;  %s452_s21 = smov [#allocation8]  }
   0xf   :  { %s17_s20 = sshll.u32 %s451_s19, 4  ;;  %s38_s22 = sshll.u32 %s452_s21, 4  ;;  %s18_s20 = int_to_ptr.vmem [resolvable:$true] %s17_s20  ;;  %s39_s22 = int_to_ptr.vmem [resolvable:$true] %s38_s22 }
  0x10   :  { %s390_s23 = scalar_lea.vmem %s18_s20, 128  ;;  %p395_p6 = scmp.lt.s32.totalorder %s18_s20, %s18_s20 }
  0x11   :  { %p391_p5 = scmp.ne.s32.totalorder %s18_s20, %s390_s23  ;;  %p396_p7 = scmp.lt.s32.totalorder %s390_s23, %s390_s23 }
  0x13   :  { %p397_p8 = por %p396_p7, %p395_p6 }
  0x15   :  { %p398_p9 = pnand %p397_p8, %p391_p5 }
  0x17   :  { %401 = shalt.err (!%p398_p9)
}
  0x18   :  { %20 = dma.hbm_to_vmem [thread:$0]  %s522_s0, 128, %s18_s20, [#allocation4]  }
  0x19   :  { %s410_s26 = scalar_lea.vmem %s39_s22, 2048  ;;  %p415_p11 = scmp.lt.s32.totalorder %s39_s22, %s39_s22 }
  0x1a   :  { %p411_p10 = scmp.ne.s32.totalorder %s39_s22, %s410_s26  ;;  %p416_p12 = scmp.lt.s32.totalorder %s410_s26, %s410_s26 }
  0x1c   :  { %p417_p13 = por %p416_p12, %p415_p11 }
  0x1e   :  { %p418_p0 = pnand %p417_p13, %p411_p10 }
  0x20   :  { %421 = shalt.err (!%p418_p0)
}
  0x21   :  { %44 = dma.hbm_to_vmem [thread:$0]  %s524_s2, 2048, %s39_s22, [#allocation7], %s449_s15, %s449_s15, %s450_s16  }
  0x22   :  { %442 = dma.done.wait [#allocation4], 128  }
  0x23   :  { %443 = vsyncadd [#allocation4], 4294967168 }
  0x24   :  { %444 = dma.done.wait [#allocation7], 4096  }
  0x25   :  { %445 = vsyncadd [#allocation7], 4294963200  ;;  %v453_v0 = vmov 0.0   ;;  %vm454_vm0 = vmmov 0   ;;  %v74_v1 = vld [vmem:[#allocation8 + $0x78] sm:$0xff]  ;;  %v73_v2 = vld [vmem:[#allocation8 + $0x70] sm:$0xff] }
  0x26   :  { %284 = vmatprep.subr.mxu0 %v453_v0  ;;  %316 = vmatprep.mubr.msk.f32.mxu0 %vm454_vm0, %v453_v0  ;;  %v72_v3 = vld [vmem:[#allocation8 + $0x68] sm:$0xff]  ;;  %v71_v4 = vld [vmem:[#allocation8 + $0x60] sm:$0xff]  ;;  %v162_v5 = vld [vmem:[#allocation6 + $0x78] sm:$0xff]  ;;  %s455_s0 = smov [#allocation9]  }
  0x27   :  { %319 = vmatprep.subr.mxu1 %v453_v0  ;;  %351 = vmatprep.mubr.msk.f32.mxu1 %vm454_vm0, %v453_v0  ;;  %v70_v6 = vld [vmem:[#allocation8 + $0x58] sm:$0xff]  ;;  %v161_v7 = vld [vmem:[#allocation6 + $0x70] sm:$0xff]  ;;  %v68_v9 = vld [vmem:[#allocation8 + $0x48] sm:$0xff]  ;;  %s240_s2 = sshll.u32 %s455_s0, 4  ;;  %s241_s2 = int_to_ptr.vmem [resolvable:$true] %s240_s2 }
  0x28   :  { %285 = vmatpush3.msra.mxu0 %v74_v1  ;;  %320 = vmatpush3.xpose.msra.mxu1 %v162_v5  ;;  %v69_v8 = vld [vmem:[#allocation8 + $0x50] sm:$0xff]  ;;  %v160_v10 = vld [vmem:[#allocation6 + $0x68] sm:$0xff]  ;;  %v67_v11 = vld [vmem:[#allocation8 + $0x40] sm:$0xff]  ;;  %s422_s28 = scalar_lea.vmem %s241_s2, 128  ;;  %p427_p2 = scmp.lt.s32.totalorder %s241_s2, %s241_s2 }
  0x29   :  { %286 = vmatprep.subr.mxu0 %v453_v0  ;;  %321 = vmatprep.subr.mxu1 %v453_v0  ;;  %v66_v12 = vld [vmem:[#allocation8 + $0x38] sm:$0xff]  ;;  %v159_v13 = vld [vmem:[#allocation6 + $0x60] sm:$0xff]  ;;  %v65_v14 = vld [vmem:[#allocation8 + $0x30] sm:$0xff]  ;;  %p423_p1 = scmp.ne.s32.totalorder %s241_s2, %s422_s28  ;;  %p428_p3 = scmp.lt.s32.totalorder %s422_s28, %s422_s28 }
  0x2a   :  { %287 = vmatpush3.msra.mxu0 %v73_v2  ;;  %v64_v15 = vld [vmem:[#allocation8 + $0x28] sm:$0xff]  ;;  %v158_v16 = vld [vmem:[#allocation6 + $0x58] sm:$0xff]  ;;  %v63_v17 = vld [vmem:[#allocation8 + $0x20] sm:$0xff] }
  0x2b   :  { %288 = vmatprep.subr.mxu0 %v453_v0  ;;  %v62_v18 = vld [vmem:[#allocation8 + $0x18] sm:$0xff]  ;;  %v157_v19 = vld [vmem:[#allocation6 + $0x50] sm:$0xff]  ;;  %v60_v21 = vld [vmem:[#allocation8 + $0x8] sm:$0xff]  ;;  %p429_p4 = por %p428_p3, %p427_p2 }
  0x2c   :  { %289 = vmatpush3.msra.mxu0 %v72_v3  ;;  %322 = vmatpush3.xpose.msra.mxu1 %v161_v7  ;;  %v61_v20 = vld [vmem:[#allocation8 + $0x10] sm:$0xff]  ;;  %v156_v22 = vld [vmem:[#allocation6 + $0x48] sm:$0xff]  ;;  %v59_v23 = vld [vmem:[#allocation8] sm:$0xff] }
  0x2d   :  { %290 = vmatprep.subr.mxu0 %v453_v0  ;;  %323 = vmatprep.subr.mxu1 %v453_v0  ;;  %v58_v24 = vld [vmem:[#allocation3] sm:$0xff]  ;;  %v155_v25 = vld [vmem:[#allocation6 + $0x40] sm:$0xff]  ;;  %v153_v27 = vld [vmem:[#allocation6 + $0x30] sm:$0xff]  ;;  %p430_p5 = pnand %p429_p4, %p423_p1 }
  0x2e   :  { %291 = vmatpush3.msra.mxu0 %v71_v4  ;;  %v154_v26 = vld [vmem:[#allocation6 + $0x38] sm:$0xff]  ;;  %v152_v28 = vld [vmem:[#allocation6 + $0x28] sm:$0xff]  ;;  %v151_v29 = vld [vmem:[#allocation6 + $0x20] sm:$0xff] }
  0x2f   :  { %292 = vmatprep.subr.mxu0 %v453_v0  ;;  %v150_v30 = vld [vmem:[#allocation6 + $0x18] sm:$0xff]  ;;  %v149_v31 = vld [vmem:[#allocation6 + $0x10] sm:$0xff]  ;;  %v148_v32 = vld [vmem:[#allocation6 + $0x8] sm:$0xff] }
  0x30   :  { %293 = vmatpush3.msra.mxu0 %v70_v6  ;;  %324 = vmatpush3.xpose.msra.mxu1 %v160_v10  ;;  %v147_v33 = vld [vmem:[#allocation6] sm:$0xff] }
  0x31   :  { %294 = vmatprep.subr.mxu0 %v453_v0  ;;  %325 = vmatprep.subr.mxu1 %v453_v0 }
  0x32   :  { %295 = vmatpush3.msra.mxu0 %v69_v8 }
  0x33   :  { %296 = vmatprep.subr.mxu0 %v453_v0 }
  0x34   :  { %297 = vmatpush3.msra.mxu0 %v68_v9  ;;  %326 = vmatpush3.xpose.msra.mxu1 %v159_v13 }
  0x35   :  { %298 = vmatprep.subr.mxu0 %v453_v0  ;;  %327 = vmatprep.subr.mxu1 %v453_v0 }
  0x36   :  { %299 = vmatpush3.msra.mxu0 %v67_v11 }
  0x37   :  { %300 = vmatprep.subr.mxu0 %v453_v0 }
  0x38   :  { %301 = vmatpush3.msra.mxu0 %v66_v12  ;;  %328 = vmatpush3.xpose.msra.mxu1 %v158_v16 }
  0x39   :  { %302 = vmatprep.subr.mxu0 %v453_v0  ;;  %329 = vmatprep.subr.mxu1 %v453_v0 }
  0x3a   :  { %303 = vmatpush3.msra.mxu0 %v65_v14 }
  0x3b   :  { %304 = vmatprep.subr.mxu0 %v453_v0 }
  0x3c   :  { %305 = vmatpush3.msra.mxu0 %v64_v15  ;;  %330 = vmatpush3.xpose.msra.mxu1 %v157_v19 }
  0x3d   :  { %306 = vmatprep.subr.mxu0 %v453_v0  ;;  %331 = vmatprep.subr.mxu1 %v453_v0 }
  0x3e   :  { %307 = vmatpush3.msra.mxu0 %v63_v17 }
  0x3f   :  { %308 = vmatprep.subr.mxu0 %v453_v0 }
  0x40   :  { %309 = vmatpush3.msra.mxu0 %v62_v18  ;;  %332 = vmatpush3.xpose.msra.mxu1 %v156_v22 }
  0x41   :  { %310 = vmatprep.subr.mxu0 %v453_v0  ;;  %333 = vmatprep.subr.mxu1 %v453_v0 }
  0x42   :  { %311 = vmatpush3.msra.mxu0 %v61_v20 }
  0x43   :  { %312 = vmatprep.subr.mxu0 %v453_v0 }
  0x44   :  { %313 = vmatpush3.msra.mxu0 %v60_v21  ;;  %334 = vmatpush3.xpose.msra.mxu1 %v155_v25 }
  0x45   :  { %314 = vmatprep.subr.mxu0 %v453_v0  ;;  %335 = vmatprep.subr.mxu1 %v453_v0 }
  0x46   :  { %315 = vmatpush3.msra.mxu0 %v59_v23 }
  0x47   :  { %317 = vmatmul.mubr.f32.vlgmr.msra.gmra.mxu0 %v58_v24 }
  0x48   :  { %336 = vmatpush3.xpose.msra.mxu1 %v154_v26 }
  0x49   :  { %337 = vmatprep.subr.mxu1 %v453_v0 }
  0x4c   :  { %338 = vmatpush3.xpose.msra.mxu1 %v153_v27 }
  0x4d   :  { %339 = vmatprep.subr.mxu1 %v453_v0 }
  0x50   :  { %340 = vmatpush3.xpose.msra.mxu1 %v152_v28 }
  0x51   :  { %341 = vmatprep.subr.mxu1 %v453_v0 }
  0x54   :  { %342 = vmatpush3.xpose.msra.mxu1 %v151_v29 }
  0x55   :  { %343 = vmatprep.subr.mxu1 %v453_v0 }
  0x58   :  { %344 = vmatpush3.xpose.msra.mxu1 %v150_v30 }
  0x59   :  { %345 = vmatprep.subr.mxu1 %v453_v0 }
  0x5c   :  { %346 = vmatpush3.xpose.msra.mxu1 %v149_v31 }
  0x5d   :  { %347 = vmatprep.subr.mxu1 %v453_v0 }
  0x60   :  { %348 = vmatpush3.xpose.msra.mxu1 %v148_v32 }
  0x61   :  { %349 = vmatprep.subr.mxu1 %v453_v0 }
  0x64   :  { %350 = vmatpush3.xpose.msra.mxu1 %v147_v33 }
 0x107   :  { %v141_v34 = vpop.f32.mrf.mxu0 }
 0x108   :  { %352 = vmatmul.mubr.f32.vlgmr.msra.gmra.mxu1 %v141_v34 }
 0x109   :  { %v318_v35 = vpop.f32.mrf.mxu0 }
 0x1c8   :  { %v229_v36 = vpop.f32.mrf.mxu1 }
 0x1c9   :  { %233 = vst [vmem:[#allocation9] sm:$0xff] %v229_v36 }
 0x1ca   :  { %v353_v37 = vpop.f32.mrf.mxu1 }
 0x1cb   :  { %433 = shalt.err (!%p430_p5)
}
 0x1cc   :  { %243 = dma.vmem_to_hbm [thread:$0]  %s241_s2, 128, %s525_s3, [#allocation5]  }
 0x1cd   :  { %446 = dma.done.wait [#allocation5], 128  }
 0x1ce   :  { %447 = vsyncadd [#allocation5], 4294967168 }
 0x1cf   :  { %247 = vsyncpa [#allocation4], 1 }
 0x1d0   :  { %248 = vsyncpa [#allocation7], 1 }
 0x1d1   :  { %249 = vsyncpa [#allocation5], 1 }

</bundles_post_ra>
